<compile_context>
chip_gen: v7x
topology: tpu7x:2x2x1
jax: 0.10.0
libtpu: 0.0.40
codegen_flags: <defaults>
</compile_context>

<pallas_src>
import functools

import jax
import jax.numpy as jnp
from jax.experimental import pallas as pl
from jax.experimental.pallas import tpu as pltpu


# ----------------------------------------------------------------------------
# Kernel
# ----------------------------------------------------------------------------
def _compound_loss_kernel(
    x_ref, t_ref,                                # inputs  (tm, ts)
    bce_ref, inter_ref, sum_p_ref, sum_t_ref,    # outputs (tm, ts) / (tm, 1)
    *, n_ji, ts, s_actual, col_mask_needed):
    ji = pl.program_id(2)

    # Dice partials accumulate in the resident output blocks: their block
    # index does not depend on ji (the innermost "arbitrary" axis), so the
    # blocks stay in VMEM across the whole spatial-inner loop.
    @pl.when(ji == 0)
    def _():
        inter_ref[...] = jnp.zeros_like(inter_ref)
        sum_p_ref[...] = jnp.zeros_like(sum_p_ref)
        sum_t_ref[...] = jnp.zeros_like(sum_t_ref)

    x = x_ref[...].astype(jnp.float32)
    t = t_ref[...].astype(jnp.float32)

    # One EUP exp per element, reused for both BCE and sigmoid.
    e = jnp.exp(-jnp.abs(x))
    # Numerically-stable BCE-with-logits (== F.binary_cross_entropy_with_logits,
    # reduction='none').  e in (0, 1], so 1 + e is well conditioned.
    bce = jnp.maximum(x, 0.0) - x * t + jnp.log(1.0 + e)
    # sigmoid(x) via the same exp; reciprocal on the EUP approx path.
    inv_1pe = pl.reciprocal(1.0 + e, approx=True)
    p = jnp.where(x >= 0, inv_1pe, e * inv_1pe)

    # Out-of-bounds portions of edge blocks are dropped at writeback, so the
    # BCE map itself needs no masking.
    bce_ref[...] = bce.astype(bce_ref.dtype)

    def _accumulate(p_v, t_v):
        inter_ref[...] += jnp.sum(p_v * t_v, axis=-1, keepdims=True)
        sum_p_ref[...] += jnp.sum(p_v, axis=-1, keepdims=True)
        sum_t_ref[...] += jnp.sum(t_v, axis=-1, keepdims=True)

    if col_mask_needed:
        # Only the last real column block overruns S; everything else takes
        # the unmasked fast path (no iota / compares / selects).
        jo = pl.program_id(1)
        col_start = (jo * n_ji + ji) * ts
        is_edge = col_start + ts > s_actual

        @pl.when(is_edge)
        def _():
            col = col_start + jax.lax.broadcasted_iota(jnp.int32, p.shape, 1)
            valid = col < s_actual
            _accumulate(jnp.where(valid, p, 0.0), jnp.where(valid, t, 0.0))

        @pl.when(jnp.logical_not(is_edge))
        def _():
            _accumulate(p, t)
    else:
        _accumulate(p, t)


# ----------------------------------------------------------------------------
# Tiling / launch
# ----------------------------------------------------------------------------
def _round_up(x, m):
    return ((x + m - 1) // m) * m


def _cdiv(a, b):
    return -(-a // b)


def _vmem_capacity_bytes():
    try:
        cap = pltpu.get_tpu_info().vmem_capacity_bytes
        if cap:
            return int(cap)
    except Exception:
        pass
    return 64 * 1024 * 1024  # conservative default (v7x per-TC VMEM)


def _choose_tiles(M, S, x_dtype, t_dtype, bce_dtype):
    cap = _vmem_capacity_bytes()
    # ~48 MiB on 64-MiB (v7x) parts, 96 MiB on 128-MiB (v5e/v6e) parts.
    vmem_limit = int(min(cap * 3 // 4, 96 << 20))

    # Row tile: multiple of 8 sublanes, up to 256 rows per block.
    tm = min(256, _round_up(M, 8))
    n_i = _cdiv(M, tm)

    x_b = jnp.dtype(x_dtype).itemsize
    t_b = jnp.dtype(t_dtype).itemsize
    o_b = jnp.dtype(bce_dtype).itemsize
    # Double-buffered in/out tiles plus ~6 full-tile f32 temporaries that
    # Mosaic may materialize (x, t promoted, e, bce, p, mask).
    per_elem = 2 * (x_b + t_b + o_b) + 6 * 4
    budget = int(vmem_limit * 0.6)
    ts_fit = max(128, (budget // (per_elem * tm)) // 128 * 128)

    # ~512K-element blocks amortize the ~0.35 us/step grid overhead; larger
    # tiles plateau on the HBM roofline (measured ~85% past 512-2048 lanes).
    ts = min(_round_up(max(128, (512 * 1024) // tm), 128), ts_fit,
             1 << 14, _round_up(S, 128))
    ts = max(ts, 128)

    n_cols = _cdiv(S, ts)
    if n_cols > 1:
        # Balance the column blocks and make their count even so the spatial
        # axis can be split 2-way across v7x's two TensorCores.
        n_cols_even = _round_up(n_cols, 2)
        ts = _round_up(_cdiv(S, n_cols_even), 128)
        n_cols = _cdiv(S, ts)
    n_jo = 2 if (n_cols >= 2 and n_cols % 2 == 0) else 1
    n_ji = n_cols // n_jo
    return tm, ts, n_i, n_jo, n_ji, vmem_limit


def _run_compound_kernel(x2d, t2d, bce_dtype=jnp.bfloat16):
    M, S = x2d.shape
    tm, ts, n_i, n_jo, n_ji, vmem_limit = _choose_tiles(
        M, S, x2d.dtype, t2d.dtype, bce_dtype)
    col_mask_needed = (n_jo * n_ji * ts != S)

    grid = (n_i, n_jo, n_ji)
    tile_spec = pl.BlockSpec((tm, ts), lambda i, jo, ji: (i, jo * n_ji + ji))
    part_spec = pl.BlockSpec((None, tm, 1), lambda i, jo, ji: (jo, i, 0))

    kernel = functools.partial(
        _compound_loss_kernel, n_ji=n_ji, ts=ts, s_actual=S,
        col_mask_needed=col_mask_needed)

    bce, inter, sum_p, sum_t = pl.pallas_call(
        kernel,
        out_shape=(
            jax.ShapeDtypeStruct((M, S), bce_dtype),
            jax.ShapeDtypeStruct((n_jo, M, 1), jnp.float32),
            jax.ShapeDtypeStruct((n_jo, M, 1), jnp.float32),
            jax.ShapeDtypeStruct((n_jo, M, 1), jnp.float32),
        ),
        grid_spec=pltpu.PrefetchScalarGridSpec(
            num_scalar_prefetch=0,
            grid=grid,
            in_specs=[tile_spec, tile_spec],
            out_specs=[tile_spec, part_spec, part_spec, part_spec],
        ),
        compiler_params=pltpu.CompilerParams(
            dimension_semantics=("parallel", "parallel", "arbitrary"),
            vmem_limit_bytes=vmem_limit),
    )(x2d, t2d)

    # Reduce the per-spatial-shard dice partials (tiny).
    inter = jnp.sum(inter, axis=0)
    sum_p = jnp.sum(sum_p, axis=0)
    sum_t = jnp.sum(sum_t, axis=0)
    return bce, inter, sum_p, sum_t


# ----------------------------------------------------------------------------
# Scalar finalization (loss components)
# ----------------------------------------------------------------------------
def _topk_bce_from_map(bce_map, n_true, k_percent=10.0):
    flat = bce_map.reshape(-1)
    k = max(1, int(n_true * k_percent / 100.0))
    # TODO(synk): replace the global sort-based selection with an in-kernel
    # histogram / k-th-value-threshold pass for large nnUNet patches (the sort
    # re-reads the whole map from HBM and dominates end-to-end time).
    topk_vals, _ = jax.lax.top_k(flat, k)
    return jnp.mean(topk_vals.astype(jnp.float32))


def _soft_dice_from_sums(inter, sum_p, sum_t, smooth=1e-5):
    # Per-(b, c) dice, then mean over rows (SoftDice with batch_dice=False,
    # all channels included).
    dc = (2.0 * inter + smooth) / (sum_p + sum_t + smooth)
    return 1.0 - jnp.mean(dc)


def _fold_rows(M, S, max_rows=256, min_lanes=2048):
    # Fold part of the spatial axis into the row axis so row blocks are well
    # utilized (and give the megacore parallel work) when B*C is tiny.
    for f in (256, 128, 64, 32, 16, 8, 4, 2):
        if (S % f == 0 and (S // f) % 128 == 0 and S // f >= min_lanes
                and M * f <= max_rows):
            return f
    return 1


@functools.partial(jax.jit, static_argnames=("weights", "k_percent"))
def compound_loss(net_output, target, weights=(1.0, 1.0), k_percent=10.0):
    """Weighted sum of TopK-BCE and SoftDice, mirroring CompoundLoss.forward."""
    B, C, H, W = net_output.shape
    M, S = B * C, H * W
    f = _fold_rows(M, S)
    x2d = net_output.reshape(M * f, S // f)
    # Binary target: pass through in whatever (preferably bf16/int8) dtype the
    # caller produced it in; the kernel promotes to f32 internally.
    t2d = target.reshape(M * f, S // f)

    bce_map, inter, sum_p, sum_t = _run_compound_kernel(x2d, t2d)

    # Un-fold the dice partials back to per-(b, c) rows.
    if f > 1:
        inter = jnp.sum(inter.reshape(M, f), axis=1, keepdims=True)
        sum_p = jnp.sum(sum_p.reshape(M, f), axis=1, keepdims=True)
        sum_t = jnp.sum(sum_t.reshape(M, f), axis=1, keepdims=True)

    components = (
        _topk_bce_from_map(bce_map, n_true=B * C * H * W, k_percent=k_percent),
        _soft_dice_from_sums(inter, sum_p, sum_t),
    )
    loss = None
    for comp, w in zip(components, weights):
        loss = comp * w if loss is None else loss + comp * w
    return loss


if __name__ == "__main__":
    key = jax.random.PRNGKey(0)
    k1, k2 = jax.random.split(key)

    B, C, H, W = 2, 4, 16, 16
    net_output = jax.random.normal(k1, (B, C, H, W), dtype=jnp.float32)
    # Binary mask produced directly in bf16 (cast where the mask is made).
    target = jax.random.bernoulli(k2, 0.3, (B, C, H, W)).astype(jnp.bfloat16)

    loss = compound_loss(net_output, target)
    jax.block_until_ready(loss)
    assert loss.shape == () and bool(jnp.isfinite(loss))
    print("KERNEL_OK")
</pallas_src>

<mosaic_0001>
module attributes {stable_mosaic.version = 11 : i64} {
  func.func @_compound_loss_kernel(%arg0: i32, %arg1: i32, %arg2: i32, %arg3: memref<8x256xf32, #tpu.memory_space<vmem>>, %arg4: memref<8x256xbf16, #tpu.memory_space<vmem>>, %arg5: memref<8x256xbf16, #tpu.memory_space<vmem>>, %arg6: memref<1x8x1xf32, #tpu.memory_space<vmem>>, %arg7: memref<1x8x1xf32, #tpu.memory_space<vmem>>, %arg8: memref<1x8x1xf32, #tpu.memory_space<vmem>>) attributes {dimension_semantics = [#tpu.dimension_semantics<parallel>, #tpu.dimension_semantics<parallel>, #tpu.dimension_semantics<arbitrary>], iteration_bounds = array<i64: 1, 1, 1>, scalar_prefetch = 0 : i64, scratch_operands = 0 : i64, tpu.core_type = #tpu.core_type<tc>, window_params = [{transform_indices = @transform_0, window_bounds = array<i64: 8, 256>}, {transform_indices = @transform_1, window_bounds = array<i64: 8, 256>}, {transform_indices = @transform_2, window_bounds = array<i64: 8, 256>}, {transform_indices = @transform_3, window_bounds = array<i64: 1, 8, 1>}, {transform_indices = @transform_4, window_bounds = array<i64: 1, 8, 1>}, {transform_indices = @transform_5, window_bounds = array<i64: 1, 8, 1>}]} {
    %c0_i32 = arith.constant 0 : i32
    %0 = arith.cmpi eq, %arg2, %c0_i32 : i32
    %1 = arith.extui %0 : i1 to i32
    %c0_i32_0 = arith.constant 0 : i32
    %2 = arith.cmpi ne, %1, %c0_i32_0 : i32
    scf.if %2 {
      %cst_31 = arith.constant 0.000000e+00 : f32
      %52 = vector.broadcast %cst_31 : f32 to vector<8x1xf32>
      %c0_32 = arith.constant 0 : index
      %c0_33 = arith.constant 0 : index
      %c0_34 = arith.constant 0 : index
      %53 = vector.load %arg6[%c0_32, %c0_33, %c0_34] : memref<1x8x1xf32, #tpu.memory_space<vmem>>, vector<1x8x1xf32>
      %54 = vector.shape_cast %53 : vector<1x8x1xf32> to vector<8x1xf32>
      %55 = vector.shape_cast %52 : vector<8x1xf32> to vector<1x8x1xf32>
      tpu.vector_store %arg6[%c0_32, %c0_33, %c0_34], %55 {strides = array<i32>} : memref<1x8x1xf32, #tpu.memory_space<vmem>>, vector<1x8x1xf32>,
      %cst_35 = arith.constant 0.000000e+00 : f32
      %56 = vector.broadcast %cst_35 : f32 to vector<8x1xf32>
      %c0_36 = arith.constant 0 : index
      %c0_37 = arith.constant 0 : index
      %c0_38 = arith.constant 0 : index
      %57 = vector.load %arg7[%c0_36, %c0_37, %c0_38] : memref<1x8x1xf32, #tpu.memory_space<vmem>>, vector<1x8x1xf32>
      %58 = vector.shape_cast %57 : vector<1x8x1xf32> to vector<8x1xf32>
      %59 = vector.shape_cast %56 : vector<8x1xf32> to vector<1x8x1xf32>
      tpu.vector_store %arg7[%c0_36, %c0_37, %c0_38], %59 {strides = array<i32>} : memref<1x8x1xf32, #tpu.memory_space<vmem>>, vector<1x8x1xf32>,
      %cst_39 = arith.constant 0.000000e+00 : f32
      %60 = vector.broadcast %cst_39 : f32 to vector<8x1xf32>
      %c0_40 = arith.constant 0 : index
      %c0_41 = arith.constant 0 : index
      %c0_42 = arith.constant 0 : index
      %61 = vector.load %arg8[%c0_40, %c0_41, %c0_42] : memref<1x8x1xf32, #tpu.memory_space<vmem>>, vector<1x8x1xf32>
      %62 = vector.shape_cast %61 : vector<1x8x1xf32> to vector<8x1xf32>
      %63 = vector.shape_cast %60 : vector<8x1xf32> to vector<1x8x1xf32>
      tpu.vector_store %arg8[%c0_40, %c0_41, %c0_42], %63 {strides = array<i32>} : memref<1x8x1xf32, #tpu.memory_space<vmem>>, vector<1x8x1xf32>,
    } else {
    }
    %c0 = arith.constant 0 : index
    %c0_1 = arith.constant 0 : index
    %3 = vector.load %arg3[%c0, %c0_1] : memref<8x256xf32, #tpu.memory_space<vmem>>, vector<8x256xf32>
    %c0_2 = arith.constant 0 : index
    %c0_3 = arith.constant 0 : index
    %4 = vector.load %arg4[%c0_2, %c0_3] : memref<8x256xbf16, #tpu.memory_space<vmem>>, vector<8x256xbf16>
    %5 = arith.extf %4 : vector<8x256xbf16> to vector<8x256xf32>
    %6 = math.absf %3 : vector<8x256xf32>
    %cst = arith.constant 0.000000e+00 : f32
    %7 = vector.broadcast %cst : f32 to vector<8x256xf32>
    %8 = arith.subf %7, %6 : vector<8x256xf32>
    %9 = math.exp %8 : vector<8x256xf32>
    %cst_4 = arith.constant 0.000000e+00 : f32
    %10 = vector.broadcast %cst_4 : f32 to vector<8x256xf32>
    %11 = arith.maximumf %3, %10 : vector<8x256xf32>
    %12 = arith.mulf %3, %5 : vector<8x256xf32>
    %13 = arith.subf %11, %12 : vector<8x256xf32>
    %cst_5 = arith.constant 1.000000e+00 : f32
    %14 = vector.broadcast %cst_5 : f32 to vector<8x256xf32>
    %15 = arith.addf %14, %9 : vector<8x256xf32>
    %16 = math.log %15 : vector<8x256xf32>
    %17 = arith.addf %13, %16 : vector<8x256xf32>
    %cst_6 = arith.constant 1.000000e+00 : f32
    %18 = vector.broadcast %cst_6 : f32 to vector<8x256xf32>
    %19 = arith.addf %18, %9 : vector<8x256xf32>
    %20 = tpu.reciprocal %19 {approx = true} : vector<8x256xf32> -> vector<8x256xf32>
    %cst_7 = arith.constant 0.000000e+00 : f32
    %21 = vector.broadcast %cst_7 : f32 to vector<8x256xf32>
    %22 = arith.cmpf oge, %3, %21 : vector<8x256xf32>
    %23 = arith.mulf %9, %20 : vector<8x256xf32>
    %24 = arith.select %22, %20, %23 : vector<8x256xi1>, vector<8x256xf32>
    %25 = arith.truncf %17 : vector<8x256xf32> to vector<8x256xbf16>
    %c0_8 = arith.constant 0 : index
    %c0_9 = arith.constant 0 : index
    %26 = vector.load %arg5[%c0_8, %c0_9] : memref<8x256xbf16, #tpu.memory_space<vmem>>, vector<8x256xbf16>
    tpu.vector_store %arg5[%c0_8, %c0_9], %25 {strides = array<i32>} : memref<8x256xbf16, #tpu.memory_space<vmem>>, vector<8x256xbf16>,
    %c0_10 = arith.constant 0 : index
    %c0_11 = arith.constant 0 : index
    %c0_12 = arith.constant 0 : index
    %27 = vector.load %arg6[%c0_10, %c0_11, %c0_12] : memref<1x8x1xf32, #tpu.memory_space<vmem>>, vector<1x8x1xf32>
    %28 = vector.shape_cast %27 : vector<1x8x1xf32> to vector<8x1xf32>
    %29 = arith.mulf %24, %5 : vector<8x256xf32>
    %cst_13 = arith.constant dense<0.000000e+00> : vector<8xf32>
    %30 = vector.multi_reduction <add>, %29, %cst_13 [1] : vector<8x256xf32> to vector<8xf32>
    %31 = vector.shape_cast %30 : vector<8xf32> to vector<8x1xf32>
    %32 = arith.addf %28, %31 : vector<8x1xf32>
    %c0_14 = arith.constant 0 : index
    %c0_15 = arith.constant 0 : index
    %c0_16 = arith.constant 0 : index
    %33 = vector.load %arg6[%c0_14, %c0_15, %c0_16] : memref<1x8x1xf32, #tpu.memory_space<vmem>>, vector<1x8x1xf32>
    %34 = vector.shape_cast %33 : vector<1x8x1xf32> to vector<8x1xf32>
    %35 = vector.shape_cast %32 : vector<8x1xf32> to vector<1x8x1xf32>
    tpu.vector_store %arg6[%c0_14, %c0_15, %c0_16], %35 {strides = array<i32>} : memref<1x8x1xf32, #tpu.memory_space<vmem>>, vector<1x8x1xf32>,
    %c0_17 = arith.constant 0 : index
    %c0_18 = arith.constant 0 : index
    %c0_19 = arith.constant 0 : index
    %36 = vector.load %arg7[%c0_17, %c0_18, %c0_19] : memref<1x8x1xf32, #tpu.memory_space<vmem>>, vector<1x8x1xf32>
    %37 = vector.shape_cast %36 : vector<1x8x1xf32> to vector<8x1xf32>
    %cst_20 = arith.constant dense<0.000000e+00> : vector<8xf32>
    %38 = vector.multi_reduction <add>, %24, %cst_20 [1] : vector<8x256xf32> to vector<8xf32>
    %39 = vector.shape_cast %38 : vector<8xf32> to vector<8x1xf32>
    %40 = arith.addf %37, %39 : vector<8x1xf32>
    %c0_21 = arith.constant 0 : index
    %c0_22 = arith.constant 0 : index
    %c0_23 = arith.constant 0 : index
    %41 = vector.load %arg7[%c0_21, %c0_22, %c0_23] : memref<1x8x1xf32, #tpu.memory_space<vmem>>, vector<1x8x1xf32>
    %42 = vector.shape_cast %41 : vector<1x8x1xf32> to vector<8x1xf32>
    %43 = vector.shape_cast %40 : vector<8x1xf32> to vector<1x8x1xf32>
    tpu.vector_store %arg7[%c0_21, %c0_22, %c0_23], %43 {strides = array<i32>} : memref<1x8x1xf32, #tpu.memory_space<vmem>>, vector<1x8x1xf32>,
    %c0_24 = arith.constant 0 : index
    %c0_25 = arith.constant 0 : index
    %c0_26 = arith.constant 0 : index
    %44 = vector.load %arg8[%c0_24, %c0_25, %c0_26] : memref<1x8x1xf32, #tpu.memory_space<vmem>>, vector<1x8x1xf32>
    %45 = vector.shape_cast %44 : vector<1x8x1xf32> to vector<8x1xf32>
    %cst_27 = arith.constant dense<0.000000e+00> : vector<8xf32>
    %46 = vector.multi_reduction <add>, %5, %cst_27 [1] : vector<8x256xf32> to vector<8xf32>
    %47 = vector.shape_cast %46 : vector<8xf32> to vector<8x1xf32>
    %48 = arith.addf %45, %47 : vector<8x1xf32>
    %c0_28 = arith.constant 0 : index
    %c0_29 = arith.constant 0 : index
    %c0_30 = arith.constant 0 : index
    %49 = vector.load %arg8[%c0_28, %c0_29, %c0_30] : memref<1x8x1xf32, #tpu.memory_space<vmem>>, vector<1x8x1xf32>
    %50 = vector.shape_cast %49 : vector<1x8x1xf32> to vector<8x1xf32>
    %51 = vector.shape_cast %48 : vector<8x1xf32> to vector<1x8x1xf32>
    tpu.vector_store %arg8[%c0_28, %c0_29, %c0_30], %51 {strides = array<i32>} : memref<1x8x1xf32, #tpu.memory_space<vmem>>, vector<1x8x1xf32>,
    return
  }
  func.func @transform_0(%arg0: i32, %arg1: i32, %arg2: i32) -> (i32, i32) {
    %c1_i32 = arith.constant 1 : i32
    %0 = arith.muli %arg1, %c1_i32 : i32
    %1 = arith.addi %0, %arg2 : i32
    %c0_i32 = arith.constant 0 : i32
    return %arg0, %1 : i32, i32
  }
  func.func @transform_1(%arg0: i32, %arg1: i32, %arg2: i32) -> (i32, i32) {
    %c1_i32 = arith.constant 1 : i32
    %0 = arith.muli %arg1, %c1_i32 : i32
    %1 = arith.addi %0, %arg2 : i32
    %c0_i32 = arith.constant 0 : i32
    return %arg0, %1 : i32, i32
  }
  func.func @transform_2(%arg0: i32, %arg1: i32, %arg2: i32) -> (i32, i32) {
    %c1_i32 = arith.constant 1 : i32
    %0 = arith.muli %arg1, %c1_i32 : i32
    %1 = arith.addi %0, %arg2 : i32
    %c0_i32 = arith.constant 0 : i32
    return %arg0, %1 : i32, i32
  }
  func.func @transform_3(%arg0: i32, %arg1: i32, %arg2: i32) -> (i32, i32, i32) {
    %c0_i32 = arith.constant 0 : i32
    %c0_i32_0 = arith.constant 0 : i32
    return %arg1, %arg0, %c0_i32 : i32, i32, i32
  }
  func.func @transform_4(%arg0: i32, %arg1: i32, %arg2: i32) -> (i32, i32, i32) {
    %c0_i32 = arith.constant 0 : i32
    %c0_i32_0 = arith.constant 0 : i32
    return %arg1, %arg0, %c0_i32 : i32, i32, i32
  }
  func.func @transform_5(%arg0: i32, %arg1: i32, %arg2: i32) -> (i32, i32, i32) {
    %c0_i32 = arith.constant 0 : i32
    %c0_i32_0 = arith.constant 0 : i32
    return %arg1, %arg0, %c0_i32 : i32, i32, i32
  }
}

</mosaic_0001>

<bundles_post_ra>
// kernel: compound_loss.1
= control target key start
LH: loop header
LB: loop body
LE: loop exit
PB: predicated region body
PF: predicated region fallthrough
CT: control target
= control target key end

     0   :  { %vm77_vm0 = vcmask 7168   ;;  %v211_v3 = vmov 0.0   ;;  %s287_s0 = inlined_call_operand.vmem [shape: f32[8,256], index: 0, kind: input, shape index: {}]   ;;  %s288_s1 = inlined_call_operand.vmem [shape: bf16[8,256], index: 1, kind: input, shape index: {}]   ;;  %s289_s3 = inlined_call_operand.vmem [shape: f32[1,8,1], index: 3, kind: output, shape index: {1}]   ;;  %s290_s2 = inlined_call_operand.vmem [shape: bf16[8,256], index: 2, kind: output, shape index: {0}]   ;;  %s291_s5 = inlined_call_operand.vmem [shape: f32[1,8,1], index: 5, kind: output, shape index: {3}]   ;;  %s292_s4 = inlined_call_operand.vmem [shape: f32[1,8,1], index: 4, kind: output, shape index: {2}]  }
   0x1   :  { %v81_v0 = vld [vmem:[%s287_s0] sm:$0xff]  ;;  %v82_v1 = vld [vmem:[%s287_s0 + $0x8] sm:$0xff]  ;;  %78 = vst.msk [vmem:[%s289_s3] sm:$0xff] %vm77_vm0, %v211_v3  ;;  %80 = vst.msk [vmem:[%s291_s5] sm:$0xff] %vm77_vm0, %v211_v3 }
   0x2   :  { %v83_v2 = vld [vmem:[%s288_s1] sm:$0xff]  ;;  %v86_v4 = vand.u32 2147483647, %v81_v0  ;;  %v87_v5 = vand.u32 2147483647, %v82_v1  ;;  %v95_v17 = vmax.f32 %v82_v1, 0.0 }
   0x3   :  { %v84_v6 = vunpack.c.l.bf16 %v83_v2  ;;  %v85_v7 = vunpack.c.h.bf16 %v83_v2  ;;  %v94_v19 = vmax.f32 %v81_v0, 0.0  ;;  %vm110_vm1 = vcmp.ge.f32.partialorder %v81_v0, 0.0  ;;  %79 = vst.msk [vmem:[%s292_s4] sm:$0xff] %vm77_vm0, %v211_v3 }
   0x4   :  { %v88_v8 = vsub.f32 0.0, %v86_v4  ;;  %v89_v9 = vsub.f32 0.0, %v87_v5  ;;  %vm111_vm2 = vcmp.ge.f32.partialorder %v82_v1, 0.0 }
   0x5   :  { %v141_v10 = vadd.f32 %v85_v7, %v84_v6  ;;  %v97_v18 = vmul.f32 %v85_v7, %v82_v1  ;;  %v96_v20 = vmul.f32 %v84_v6, %v81_v0 }
   0x6   :  { %v90_v11 = vmul.f32 1.442695, %v88_v8  ;;  %v92_v12 = vmul.f32 1.442695, %v89_v9 }
   0x7   :  { %142 = vadd.xlane.f32.xlu1 %v141_v10  ;;  %v99_v22 = vsub.f32 %v95_v17, %v97_v18  ;;  %v98_v26 = vsub.f32 %v94_v19, %v96_v20 }
   0x8   :  { %199 = vpow2.f32 %v90_v11  ;;  %v140_v40 = vld [vmem:[%s291_s5] sm:$0xff] }
   0x9   :  { %201 = vpow2.f32 %v92_v12  ;;  %v125_v43 = vld [vmem:[%s289_s3] sm:$0xff] }
   0xa   :  { %v134_v46 = vld [vmem:[%s292_s4] sm:$0xff] }
  0x12   :  { %v200_v13 = vpop.eup %199 }
  0x13   :  { %v202_v14 = vpop.eup %201  ;;  %v100_v15 = vadd.f32 1.0, %v200_v13 }
  0x14   :  { %v101_v16 = vadd.f32 1.0, %v202_v14 }
  0x15   :  { %203 = vrcp.f32 %v100_v15 }
  0x16   :  { %205 = vlog2.f32 %v101_v16 }
  0x17   :  { %207 = vrcp.f32 %v101_v16 }
  0x18   :  { %209 = vlog2.f32 %v100_v15 }
  0x1f   :  { %v204_v21 = vpop.eup %203 }
  0x20   :  { %v206_v23 = vpop.eup %205  ;;  %v112_v24 = vmul.f32 %v204_v21, %v200_v13 }
  0x21   :  { %v208_v25 = vpop.eup %207  ;;  %v105_v27 = vmul.f32 0.6931472, %v206_v23 }
  0x22   :  { %v210_v28 = vpop.eup %209  ;;  %v113_v29 = vmul.f32 %v208_v25, %v202_v14  ;;  %v114_v30 = vsel %vm110_vm1, %v204_v21, %v112_v24 }
  0x23   :  { %v107_v31 = vadd.f32 %v105_v27, %v99_v22  ;;  %v126_v32 = vmul.f32 %v114_v30, %v84_v6  ;;  %v103_v33 = vmul.f32 0.6931472, %v210_v28 }
  0x24   :  { %v115_v34 = vsel %vm111_vm2, %v208_v25, %v113_v29 }
  0x25   :  { %v127_v35 = vmul.f32 %v115_v34, %v85_v7  ;;  %v106_v36 = vadd.f32 %v103_v33, %v98_v26  ;;  %v135_v39 = vadd.f32 %v115_v34, %v114_v30 }
  0x27   :  { %v128_v37 = vadd.f32 %v127_v35, %v126_v32  ;;  %v197_v38 = vpack.c.bf16 %v107_v31, %v106_v36 }
  0x29   :  { %129 = vadd.xlane.f32.xlu0 %v128_v37  ;;  %124 = vst [vmem:[%s290_s2] sm:$0xff] %v197_v38 }
  0x2d   :  { %136 = vadd.xlane.f32.xlu0 %v135_v39 }
  0x94   :  { %v143_v41 = vpop.xlane.xlu1 %142 }
  0x95   :  { %v144_v42 = vadd.f32 %v143_v41, %v140_v40 }
  0x97   :  { %145 = vst.msk [vmem:[%s291_s5] sm:$0xff] %vm77_vm0, %v144_v42 }
  0xb6   :  { %v130_v44 = vpop.xlane.xlu0 %129 }
  0xb7   :  { %v131_v45 = vadd.f32 %v130_v44, %v125_v43 }
  0xb9   :  { %133 = vst.msk [vmem:[%s289_s3] sm:$0xff] %vm77_vm0, %v131_v45 }
  0xba   :  { %v137_v47 = vpop.xlane.xlu0 %136 }
  0xbb   :  { %v138_v48 = vadd.f32 %v137_v47, %v134_v46 }
  0xbd   :  { %139 = vst.msk [vmem:[%s292_s4] sm:$0xff] %vm77_vm0, %v138_v48 }

</bundles_post_ra>
